<compile_context>
chip_gen: v5e
topology: v5e:2x2
jax: 0.10.0
libtpu: 0.0.40
codegen_flags: <defaults>
</compile_context>

<pallas_src>
import functools

import numpy as np
import jax
import jax.numpy as jnp
from jax.experimental import pallas as pl
from jax.experimental.pallas import tpu as pltpu

_LANES = 128
_HALF_LOG_2PI = 0.9189385332046727          # 0.5 * log(2*pi)

# Lanczos g=5, n=6 (Numerical Recipes): |rel err| < 2e-10 for z > 0 — far beyond f32 needs
# and ~35% fewer Horner ops than the previous g=7/n=9 series.
_LANCZOS_G = 5.0
_LANCZOS_COEFFS = (
    1.000000000190015,
    76.18009172947146,
    -86.50532032941677,
    24.01409824083091,
    -1.231739572450155,
    1.208650973866179e-3,
    -5.395239384953e-6,
)
# Constant scale folded into both polynomials: keeps the fused product
# (num_s*den_a*den_b)/(num_a*num_b*den_s) inside f32 range for concentrations up to ~500.
_COEFF_SCALE = 2.0 ** -20


def _poly_mul(p, q):
    out = [0.0] * (len(p) + len(q) - 1)
    for i, pi in enumerate(p):
        for j, qj in enumerate(q):
            out[i + j] += pi * qj
    return out


def _lanczos_rational_coeffs():
    """Collapse A(z) = c0 + sum_k c_k/(z+k) into num(z)/den(z) with den(z) = z*prod_k(z+k),
    i.e. num/den == A(z)/z, so a single divide handles the whole Beta normalizer. All
    resulting coefficients are positive for g=5 => no cancellation in the f32 Horner."""
    c = [float(x) for x in _LANCZOS_COEFFS]
    k_max = len(c) - 1
    prod_all = [1.0]
    for j in range(1, k_max + 1):
        prod_all = _poly_mul(prod_all, [1.0, float(j)])            # * (z + j)
    num = [c[0] * x for x in prod_all]
    for k in range(1, k_max + 1):
        dk = [1.0]
        for j in range(1, k_max + 1):
            if j != k:
                dk = _poly_mul(dk, [1.0, float(j)])
        off = len(num) - len(dk)
        for idx, coeff in enumerate(dk):
            num[off + idx] += c[k] * coeff
    den = _poly_mul(prod_all, [1.0, 0.0])                           # * z
    num = tuple(x * _COEFF_SCALE for x in num)
    den = tuple(x * _COEFF_SCALE for x in den)
    return num, den


_LANCZOS_NUM, _LANCZOS_DEN = _lanczos_rational_coeffs()


def _horner(coeffs, z):
    acc = coeffs[0] * z + coeffs[1]
    for c in coeffs[2:]:
        acc = acc * z + c
    return acc


def _beta_logprob(a, b, t):
    """Beta(a, b).log_prob(t_adj) for a whole tile in f32 using the fused Lanczos normalizer.
    EUP cost: 6 logs + 1 divide per element."""
    eps = jnp.float32(1e-6)
    t_adj = jnp.where(t == 0.0, t + eps, t)
    t_adj = jnp.where(t == 1.0, t_adj - eps, t_adj)

    s = a + b
    g_half = jnp.float32(_LANCZOS_G + 0.5)
    # lgamma(z) = HALF_LOG_2PI + (z+0.5)*log(z+g+0.5) - (z+g+0.5) + log(num(z)/den(z))
    st_a = (a + 0.5) * jnp.log(a + g_half)
    st_b = (b + 0.5) * jnp.log(b + g_half)
    st_s = (s + 0.5) * jnp.log(s + g_half)

    num_a = _horner(_LANCZOS_NUM, a)
    den_a = _horner(_LANCZOS_DEN, a)
    num_b = _horner(_LANCZOS_NUM, b)
    den_b = _horner(_LANCZOS_DEN, b)
    num_s = _horner(_LANCZOS_NUM, s)
    den_s = _horner(_LANCZOS_DEN, s)

    # lgamma(a+b) - lgamma(a) - lgamma(b): the -(z+5.5) linear terms collapse to +5.5 and the
    # three Lanczos ratios fuse into a single divide + single log (VPU muls are cheap).
    ratio = (num_s * den_a * den_b) / (num_a * num_b * den_s)
    log_norm = (st_s - st_a - st_b) \
        + jnp.float32(_LANCZOS_G + 0.5 - _HALF_LOG_2PI) + jnp.log(ratio)

    return (a - 1.0) * jnp.log(t_adj) + (b - 1.0) * jnp.log(1.0 - t_adj) + log_norm


def _beta_loss_kernel(a_ref, b_ref, t_ref, out_ref, *,
                      steps_per_core, tile_rows, n_valid, last_block, needs_mask):
    i = pl.program_id(1)

    @pl.when(i == 0)
    def _init():
        out_ref[...] = jnp.zeros_like(out_ref)

    a = a_ref[...].astype(jnp.float32)
    b = b_ref[...].astype(jnp.float32)
    t = t_ref[...].astype(jnp.float32)
    logp = _beta_logprob(a, b, t)

    if needs_mask:
        gblock = pl.program_id(0) * steps_per_core + i

        @pl.when(gblock < last_block)
        def _acc_interior():
            # Hot loop: no mask work at all.
            out_ref[...] += jnp.sum(logp, axis=0, keepdims=True)

        @pl.when(gblock >= last_block)
        def _acc_edge():
            # Lane padding, the partial last block's over-read sublanes, and any duplicated
            # (index-clamped) trailing block all land here. jnp.where is a select (never a
            # multiply), so garbage/NaN contributions are discarded exactly.
            row = jax.lax.broadcasted_iota(jnp.int32, logp.shape, 0)
            col = jax.lax.broadcasted_iota(jnp.int32, logp.shape, 1)
            gidx = (gblock * tile_rows + row) * _LANES + col
            out_ref[...] += jnp.sum(jnp.where(gidx < n_valid, logp, 0.0),
                                    axis=0, keepdims=True)
    else:
        out_ref[...] += jnp.sum(logp, axis=0, keepdims=True)


def _as_flat_input(x):
    x = jnp.asarray(x)
    if x.dtype != jnp.bfloat16 and x.dtype != jnp.float32:
        x = x.astype(jnp.float32)   # bf16 inputs stay bf16 (halves HBM bytes on v5e)
    return x.reshape(-1)


def beta_logprob_loss(alphas, betas, targets, *, tile_m=1024):
    """Pallas TPU implementation of BetaLogProbLoss.forward for arbitrary-size inputs."""
    a = _as_flat_input(alphas)
    b = _as_flat_input(betas)
    t = _as_flat_input(targets)
    n = int(a.shape[0])
    assert n > 0 and int(b.shape[0]) == n and int(t.shape[0]) == n

    rows = -(-n // _LANES)
    lane_pad = rows * _LANES - n
    if lane_pad:
        # Only ever <= 127 elements; rows are never rounded up to tile_m (the edge mask in
        # the kernel covers the ragged tail instead of a full-array padding copy).
        a = jnp.pad(a, (0, lane_pad))
        b = jnp.pad(b, (0, lane_pad))
        t = jnp.pad(t, (0, lane_pad))
    a2 = a.reshape(rows, _LANES)
    b2 = b.reshape(rows, _LANES)
    t2 = t.reshape(rows, _LANES)

    granule = 16 if any(x.dtype == jnp.bfloat16 for x in (a2, b2, t2)) else 8
    tile_m = max(granule, (int(tile_m) // granule) * granule)
    tile_rows = rows if rows <= tile_m else tile_m     # full-dim block is always legal
    total_steps = -(-rows // tile_rows)

    # Outer "parallel" axis: lets v7x split the reduction across its two TensorCores with a
    # per-core accumulator row; on single-TC v5e/v6e it is just a short serial loop.
    cores = 2 if total_steps >= 2 else 1
    steps_per_core = -(-total_steps // cores)
    last_block = total_steps - 1
    has_dup = cores * steps_per_core != total_steps
    needs_mask = bool(lane_pad) or (total_steps * tile_rows != rows) or has_dup

    if has_dup:
        # Clamp so a duplicated trailing block reads valid memory; its contribution is
        # zeroed exactly by the edge mask (its unclamped gidx >= n).
        in_idx = lambda c, i: (jnp.minimum(c * steps_per_core + i, last_block), 0)
    else:
        in_idx = lambda c, i: (c * steps_per_core + i, 0)

    kernel = functools.partial(
        _beta_loss_kernel, steps_per_core=steps_per_core, tile_rows=tile_rows,
        n_valid=n, last_block=last_block, needs_mask=needs_mask)
    in_spec = pl.BlockSpec((tile_rows, _LANES), in_idx)

    partial = pl.pallas_call(
        kernel,
        out_shape=jax.ShapeDtypeStruct((cores, _LANES), jnp.float32),
        grid=(cores, steps_per_core),
        in_specs=[in_spec, in_spec, in_spec],
        out_specs=pl.BlockSpec((1, _LANES), lambda c, i: (c, 0)),
        compiler_params=pltpu.CompilerParams(
            dimension_semantics=("parallel", "arbitrary")),
    )(a2, b2, t2)

    # Tiny epilogue (cores*128 lane sums + -1/N scale) in plain JAX.
    return jnp.sum(partial) * (-1.0 / n)


def _reference_loss(alphas, betas, targets):
    """Pure-JAX reference (outside Pallas) for validation."""
    eps = jnp.float32(1e-6)
    t = jnp.asarray(targets, jnp.float32)
    t_adj = jnp.where(t == 0.0, t + eps, t)
    t_adj = jnp.where(t == 1.0, t_adj - eps, t_adj)
    a = jnp.asarray(alphas, jnp.float32)
    b = jnp.asarray(betas, jnp.float32)
    lgam = jax.scipy.special.gammaln
    logp = (a - 1.0) * jnp.log(t_adj) + (b - 1.0) * jnp.log(1.0 - t_adj) \
        + lgam(a + b) - lgam(a) - lgam(b)
    return -jnp.mean(logp)


def _check(loss, ref, tag):
    loss = float(loss)
    ref = float(ref)
    if not np.isfinite(loss):
        raise RuntimeError(f"{tag}: kernel produced non-finite loss")
    if not np.allclose(loss, ref, rtol=1e-3, atol=1e-4):
        raise RuntimeError(f"{tag}: mismatch kernel={loss} ref={ref}")


if __name__ == "__main__":
    # BetaLogProbLoss has no parameters; it consumes per-example Beta params and targets.

    # Case 1: non-multiple-of-128 batch -> lane pad + single partial (masked) block.
    k1, k2, k3 = jax.random.split(jax.random.PRNGKey(0), 3)
    n1 = 300
    alphas1 = jnp.exp(jax.random.normal(k1, (n1,), jnp.float32) * 0.5)
    betas1 = jnp.exp(jax.random.normal(k2, (n1,), jnp.float32) * 0.5)
    targets1 = jax.random.uniform(k3, (n1,), jnp.float32)
    targets1 = targets1.at[0].set(0.0).at[1].set(1.0).at[2].set(0.0).at[3].set(1.0)
    loss1 = jax.block_until_ready(beta_logprob_loss(alphas1, betas1, targets1))
    ref1 = jax.block_until_ready(_reference_loss(alphas1, betas1, targets1))
    _check(loss1, ref1, "case1")

    # Case 2: small tile -> multi-step 2-core grid, fully unmasked hot path.
    k4, k5, k6 = jax.random.split(jax.random.PRNGKey(1), 3)
    n2 = 4096
    alphas2 = jnp.exp(jax.random.normal(k4, (n2,), jnp.float32) * 0.5)
    betas2 = jnp.exp(jax.random.normal(k5, (n2,), jnp.float32) * 0.5)
    targets2 = jax.random.uniform(k6, (n2,), jnp.float32)
    targets2 = targets2.at[0].set(0.0).at[1].set(1.0)
    loss2 = jax.block_until_ready(beta_logprob_loss(alphas2, betas2, targets2, tile_m=8))
    ref2 = jax.block_until_ready(_reference_loss(alphas2, betas2, targets2))
    _check(loss2, ref2, "case2")

    # Case 3: ragged tail + odd step count -> clamped duplicate block + edge mask + lane pad.
    k7, k8, k9 = jax.random.split(jax.random.PRNGKey(2), 3)
    n3 = 5157
    alphas3 = jnp.exp(jax.random.normal(k7, (n3,), jnp.float32) * 0.5)
    betas3 = jnp.exp(jax.random.normal(k8, (n3,), jnp.float32) * 0.5)
    targets3 = jax.random.uniform(k9, (n3,), jnp.float32)
    targets3 = targets3.at[0].set(0.0).at[-1].set(1.0)
    loss3 = jax.block_until_ready(beta_logprob_loss(alphas3, betas3, targets3, tile_m=16))
    ref3 = jax.block_until_ready(_reference_loss(alphas3, betas3, targets3))
    _check(loss3, ref3, "case3")

    # Case 4: large concentrations (a+b up to ~160) -> validates the fused f32 Lanczos
    # rational against gammaln in the flagged a+b > 50 regime.
    ka, kb, kt = jax.random.split(jax.random.PRNGKey(3), 3)
    n4 = 1024
    alphas4 = jax.random.uniform(ka, (n4,), jnp.float32, 20.0, 80.0)
    betas4 = jax.random.uniform(kb, (n4,), jnp.float32, 20.0, 80.0)
    targets4 = jax.random.uniform(kt, (n4,), jnp.float32, 0.05, 0.95)
    loss4 = jax.block_until_ready(beta_logprob_loss(alphas4, betas4, targets4))
    ref4 = jax.block_until_ready(_reference_loss(alphas4, betas4, targets4))
    _check(loss4, ref4, "case4")

    print("KERNEL_OK")
</pallas_src>

<mosaic_0001>
module attributes {stable_mosaic.version = 11 : i64} {
  func.func @_beta_loss_kernel(%arg0: i32, %arg1: i32, %arg2: memref<3x128xf32, #tpu.memory_space<vmem>>, %arg3: memref<3x128xf32, #tpu.memory_space<vmem>>, %arg4: memref<3x128xf32, #tpu.memory_space<vmem>>, %arg5: memref<1x128xf32, #tpu.memory_space<vmem>>) attributes {dimension_semantics = [#tpu.dimension_semantics<parallel>, #tpu.dimension_semantics<arbitrary>], iteration_bounds = array<i64: 1, 1>, scalar_prefetch = 0 : i64, scratch_operands = 0 : i64, tpu.core_type = #tpu.core_type<tc>, window_params = [{transform_indices = @transform_0, window_bounds = array<i64: 3, 128>}, {transform_indices = @transform_1, window_bounds = array<i64: 3, 128>}, {transform_indices = @transform_2, window_bounds = array<i64: 3, 128>}, {transform_indices = @transform_3, window_bounds = array<i64: 1, 128>}]} {
    %c0_i32 = arith.constant 0 : i32
    %0 = arith.cmpi eq, %arg1, %c0_i32 : i32
    %1 = arith.extui %0 : i1 to i32
    %c0_i32_0 = arith.constant 0 : i32
    %2 = arith.cmpi ne, %1, %c0_i32_0 : i32
    scf.if %2 {
      %cst_68 = arith.constant 0.000000e+00 : f32
      %189 = vector.broadcast %cst_68 : f32 to vector<1x128xf32>
      %c0_69 = arith.constant 0 : index
      %c0_70 = arith.constant 0 : index
      %190 = vector.load %arg5[%c0_69, %c0_70] : memref<1x128xf32, #tpu.memory_space<vmem>>, vector<1x128xf32>
      tpu.vector_store %arg5[%c0_69, %c0_70], %189 {strides = array<i32>} : memref<1x128xf32, #tpu.memory_space<vmem>>, vector<1x128xf32>,
    } else {
    }
    %c0 = arith.constant 0 : index
    %c0_1 = arith.constant 0 : index
    %3 = vector.load %arg2[%c0, %c0_1] : memref<3x128xf32, #tpu.memory_space<vmem>>, vector<3x128xf32>
    %c0_2 = arith.constant 0 : index
    %c0_3 = arith.constant 0 : index
    %4 = vector.load %arg3[%c0_2, %c0_3] : memref<3x128xf32, #tpu.memory_space<vmem>>, vector<3x128xf32>
    %c0_4 = arith.constant 0 : index
    %c0_5 = arith.constant 0 : index
    %5 = vector.load %arg4[%c0_4, %c0_5] : memref<3x128xf32, #tpu.memory_space<vmem>>, vector<3x128xf32>
    %cst = arith.constant 0.000000e+00 : f32
    %6 = vector.broadcast %cst : f32 to vector<3x128xf32>
    %7 = arith.cmpf oeq, %5, %6 : vector<3x128xf32>
    %cst_6 = arith.constant 9.99999997E-7 : f32
    %8 = vector.broadcast %cst_6 : f32 to vector<3x128xf32>
    %9 = arith.addf %5, %8 : vector<3x128xf32>
    %10 = arith.select %7, %9, %5 : vector<3x128xi1>, vector<3x128xf32>
    %cst_7 = arith.constant 1.000000e+00 : f32
    %11 = vector.broadcast %cst_7 : f32 to vector<3x128xf32>
    %12 = arith.cmpf oeq, %5, %11 : vector<3x128xf32>
    %cst_8 = arith.constant 9.99999997E-7 : f32
    %13 = vector.broadcast %cst_8 : f32 to vector<3x128xf32>
    %14 = arith.subf %10, %13 : vector<3x128xf32>
    %15 = arith.select %12, %14, %10 : vector<3x128xi1>, vector<3x128xf32>
    %16 = arith.addf %3, %4 : vector<3x128xf32>
    %cst_9 = arith.constant 5.000000e-01 : f32
    %17 = vector.broadcast %cst_9 : f32 to vector<3x128xf32>
    %18 = arith.addf %3, %17 : vector<3x128xf32>
    %cst_10 = arith.constant 5.500000e+00 : f32
    %19 = vector.broadcast %cst_10 : f32 to vector<3x128xf32>
    %20 = arith.addf %3, %19 : vector<3x128xf32>
    %21 = math.log %20 : vector<3x128xf32>
    %22 = arith.mulf %18, %21 : vector<3x128xf32>
    %cst_11 = arith.constant 5.000000e-01 : f32
    %23 = vector.broadcast %cst_11 : f32 to vector<3x128xf32>
    %24 = arith.addf %4, %23 : vector<3x128xf32>
    %cst_12 = arith.constant 5.500000e+00 : f32
    %25 = vector.broadcast %cst_12 : f32 to vector<3x128xf32>
    %26 = arith.addf %4, %25 : vector<3x128xf32>
    %27 = math.log %26 : vector<3x128xf32>
    %28 = arith.mulf %24, %27 : vector<3x128xf32>
    %cst_13 = arith.constant 5.000000e-01 : f32
    %29 = vector.broadcast %cst_13 : f32 to vector<3x128xf32>
    %30 = arith.addf %16, %29 : vector<3x128xf32>
    %cst_14 = arith.constant 5.500000e+00 : f32
    %31 = vector.broadcast %cst_14 : f32 to vector<3x128xf32>
    %32 = arith.addf %16, %31 : vector<3x128xf32>
    %33 = math.log %32 : vector<3x128xf32>
    %34 = arith.mulf %30, %33 : vector<3x128xf32>
    %cst_15 = arith.constant 9.53674316E-7 : f32
    %35 = vector.broadcast %cst_15 : f32 to vector<3x128xf32>
    %36 = arith.mulf %35, %3 : vector<3x128xf32>
    %cst_16 = arith.constant 3.1908352E-5 : f32
    %37 = vector.broadcast %cst_16 : f32 to vector<3x128xf32>
    %38 = arith.addf %36, %37 : vector<3x128xf32>
    %39 = arith.mulf %38, %3 : vector<3x128xf32>
    %cst_17 = arith.constant 4.44730947E-4 : f32
    %40 = vector.broadcast %cst_17 : f32 to vector<3x128xf32>
    %41 = arith.addf %39, %40 : vector<3x128xf32>
    %42 = arith.mulf %41, %3 : vector<3x128xf32>
    %cst_18 = arith.constant 0.00330515811 : f32
    %43 = vector.broadcast %cst_18 : f32 to vector<3x128xf32>
    %44 = arith.addf %42, %43 : vector<3x128xf32>
    %45 = arith.mulf %44, %3 : vector<3x128xf32>
    %cst_19 = arith.constant 0.0138138905 : f32
    %46 = vector.broadcast %cst_19 : f32 to vector<3x128xf32>
    %47 = arith.addf %45, %46 : vector<3x128xf32>
    %48 = arith.mulf %47, %3 : vector<3x128xf32>
    %cst_20 = arith.constant 0.0307856221 : f32
    %49 = vector.broadcast %cst_20 : f32 to vector<3x128xf32>
    %50 = arith.addf %48, %49 : vector<3x128xf32>
    %51 = arith.mulf %50, %3 : vector<3x128xf32>
    %cst_21 = arith.constant 0.0285812318 : f32
    %52 = vector.broadcast %cst_21 : f32 to vector<3x128xf32>
    %53 = arith.addf %51, %52 : vector<3x128xf32>
    %cst_22 = arith.constant 9.53674316E-7 : f32
    %54 = vector.broadcast %cst_22 : f32 to vector<3x128xf32>
    %55 = arith.mulf %54, %3 : vector<3x128xf32>
    %cst_23 = arith.constant 2.00271606E-5 : f32
    %56 = vector.broadcast %cst_23 : f32 to vector<3x128xf32>
    %57 = arith.addf %55, %56 : vector<3x128xf32>
    %58 = arith.mulf %57, %3 : vector<3x128xf32>
    %cst_24 = arith.constant 1.668930e-04 : f32
    %59 = vector.broadcast %cst_24 : f32 to vector<3x128xf32>
    %60 = arith.addf %58, %59 : vector<3x128xf32>
    %61 = arith.mulf %60, %3 : vector<3x128xf32>
    %cst_25 = arith.constant 7.00950623E-4 : f32
    %62 = vector.broadcast %cst_25 : f32 to vector<3x128xf32>
    %63 = arith.addf %61, %62 : vector<3x128xf32>
    %64 = arith.mulf %63, %3 : vector<3x128xf32>
    %cst_26 = arith.constant 0.00154876709 : f32
    %65 = vector.broadcast %cst_26 : f32 to vector<3x128xf32>
    %66 = arith.addf %64, %65 : vector<3x128xf32>
    %67 = arith.mulf %66, %3 : vector<3x128xf32>
    %cst_27 = arith.constant 0.00168228149 : f32
    %68 = vector.broadcast %cst_27 : f32 to vector<3x128xf32>
    %69 = arith.addf %67, %68 : vector<3x128xf32>
    %70 = arith.mulf %69, %3 : vector<3x128xf32>
    %cst_28 = arith.constant 6.86645508E-4 : f32
    %71 = vector.broadcast %cst_28 : f32 to vector<3x128xf32>
    %72 = arith.addf %70, %71 : vector<3x128xf32>
    %73 = arith.mulf %72, %3 : vector<3x128xf32>
    %cst_29 = arith.constant 0.000000e+00 : f32
    %74 = vector.broadcast %cst_29 : f32 to vector<3x128xf32>
    %75 = arith.addf %73, %74 : vector<3x128xf32>
    %cst_30 = arith.constant 9.53674316E-7 : f32
    %76 = vector.broadcast %cst_30 : f32 to vector<3x128xf32>
    %77 = arith.mulf %76, %4 : vector<3x128xf32>
    %cst_31 = arith.constant 3.1908352E-5 : f32
    %78 = vector.broadcast %cst_31 : f32 to vector<3x128xf32>
    %79 = arith.addf %77, %78 : vector<3x128xf32>
    %80 = arith.mulf %79, %4 : vector<3x128xf32>
    %cst_32 = arith.constant 4.44730947E-4 : f32
    %81 = vector.broadcast %cst_32 : f32 to vector<3x128xf32>
    %82 = arith.addf %80, %81 : vector<3x128xf32>
    %83 = arith.mulf %82, %4 : vector<3x128xf32>
    %cst_33 = arith.constant 0.00330515811 : f32
    %84 = vector.broadcast %cst_33 : f32 to vector<3x128xf32>
    %85 = arith.addf %83, %84 : vector<3x128xf32>
    %86 = arith.mulf %85, %4 : vector<3x128xf32>
    %cst_34 = arith.constant 0.0138138905 : f32
    %87 = vector.broadcast %cst_34 : f32 to vector<3x128xf32>
    %88 = arith.addf %86, %87 : vector<3x128xf32>
    %89 = arith.mulf %88, %4 : vector<3x128xf32>
    %cst_35 = arith.constant 0.0307856221 : f32
    %90 = vector.broadcast %cst_35 : f32 to vector<3x128xf32>
    %91 = arith.addf %89, %90 : vector<3x128xf32>
    %92 = arith.mulf %91, %4 : vector<3x128xf32>
    %cst_36 = arith.constant 0.0285812318 : f32
    %93 = vector.broadcast %cst_36 : f32 to vector<3x128xf32>
    %94 = arith.addf %92, %93 : vector<3x128xf32>
    %cst_37 = arith.constant 9.53674316E-7 : f32
    %95 = vector.broadcast %cst_37 : f32 to vector<3x128xf32>
    %96 = arith.mulf %95, %4 : vector<3x128xf32>
    %cst_38 = arith.constant 2.00271606E-5 : f32
    %97 = vector.broadcast %cst_38 : f32 to vector<3x128xf32>
    %98 = arith.addf %96, %97 : vector<3x128xf32>
    %99 = arith.mulf %98, %4 : vector<3x128xf32>
    %cst_39 = arith.constant 1.668930e-04 : f32
    %100 = vector.broadcast %cst_39 : f32 to vector<3x128xf32>
    %101 = arith.addf %99, %100 : vector<3x128xf32>
    %102 = arith.mulf %101, %4 : vector<3x128xf32>
    %cst_40 = arith.constant 7.00950623E-4 : f32
    %103 = vector.broadcast %cst_40 : f32 to vector<3x128xf32>
    %104 = arith.addf %102, %103 : vector<3x128xf32>
    %105 = arith.mulf %104, %4 : vector<3x128xf32>
    %cst_41 = arith.constant 0.00154876709 : f32
    %106 = vector.broadcast %cst_41 : f32 to vector<3x128xf32>
    %107 = arith.addf %105, %106 : vector<3x128xf32>
    %108 = arith.mulf %107, %4 : vector<3x128xf32>
    %cst_42 = arith.constant 0.00168228149 : f32
    %109 = vector.broadcast %cst_42 : f32 to vector<3x128xf32>
    %110 = arith.addf %108, %109 : vector<3x128xf32>
    %111 = arith.mulf %110, %4 : vector<3x128xf32>
    %cst_43 = arith.constant 6.86645508E-4 : f32
    %112 = vector.broadcast %cst_43 : f32 to vector<3x128xf32>
    %113 = arith.addf %111, %112 : vector<3x128xf32>
    %114 = arith.mulf %113, %4 : vector<3x128xf32>
    %cst_44 = arith.constant 0.000000e+00 : f32
    %115 = vector.broadcast %cst_44 : f32 to vector<3x128xf32>
    %116 = arith.addf %114, %115 : vector<3x128xf32>
    %cst_45 = arith.constant 9.53674316E-7 : f32
    %117 = vector.broadcast %cst_45 : f32 to vector<3x128xf32>
    %118 = arith.mulf %117, %16 : vector<3x128xf32>
    %cst_46 = arith.constant 3.1908352E-5 : f32
    %119 = vector.broadcast %cst_46 : f32 to vector<3x128xf32>
    %120 = arith.addf %118, %119 : vector<3x128xf32>
    %121 = arith.mulf %120, %16 : vector<3x128xf32>
    %cst_47 = arith.constant 4.44730947E-4 : f32
    %122 = vector.broadcast %cst_47 : f32 to vector<3x128xf32>
    %123 = arith.addf %121, %122 : vector<3x128xf32>
    %124 = arith.mulf %123, %16 : vector<3x128xf32>
    %cst_48 = arith.constant 0.00330515811 : f32
    %125 = vector.broadcast %cst_48 : f32 to vector<3x128xf32>
    %126 = arith.addf %124, %125 : vector<3x128xf32>
    %127 = arith.mulf %126, %16 : vector<3x128xf32>
    %cst_49 = arith.constant 0.0138138905 : f32
    %128 = vector.broadcast %cst_49 : f32 to vector<3x128xf32>
    %129 = arith.addf %127, %128 : vector<3x128xf32>
    %130 = arith.mulf %129, %16 : vector<3x128xf32>
    %cst_50 = arith.constant 0.0307856221 : f32
    %131 = vector.broadcast %cst_50 : f32 to vector<3x128xf32>
    %132 = arith.addf %130, %131 : vector<3x128xf32>
    %133 = arith.mulf %132, %16 : vector<3x128xf32>
    %cst_51 = arith.constant 0.0285812318 : f32
    %134 = vector.broadcast %cst_51 : f32 to vector<3x128xf32>
    %135 = arith.addf %133, %134 : vector<3x128xf32>
    %cst_52 = arith.constant 9.53674316E-7 : f32
    %136 = vector.broadcast %cst_52 : f32 to vector<3x128xf32>
    %137 = arith.mulf %136, %16 : vector<3x128xf32>
    %cst_53 = arith.constant 2.00271606E-5 : f32
    %138 = vector.broadcast %cst_53 : f32 to vector<3x128xf32>
    %139 = arith.addf %137, %138 : vector<3x128xf32>
    %140 = arith.mulf %139, %16 : vector<3x128xf32>
    %cst_54 = arith.constant 1.668930e-04 : f32
    %141 = vector.broadcast %cst_54 : f32 to vector<3x128xf32>
    %142 = arith.addf %140, %141 : vector<3x128xf32>
    %143 = arith.mulf %142, %16 : vector<3x128xf32>
    %cst_55 = arith.constant 7.00950623E-4 : f32
    %144 = vector.broadcast %cst_55 : f32 to vector<3x128xf32>
    %145 = arith.addf %143, %144 : vector<3x128xf32>
    %146 = arith.mulf %145, %16 : vector<3x128xf32>
    %cst_56 = arith.constant 0.00154876709 : f32
    %147 = vector.broadcast %cst_56 : f32 to vector<3x128xf32>
    %148 = arith.addf %146, %147 : vector<3x128xf32>
    %149 = arith.mulf %148, %16 : vector<3x128xf32>
    %cst_57 = arith.constant 0.00168228149 : f32
    %150 = vector.broadcast %cst_57 : f32 to vector<3x128xf32>
    %151 = arith.addf %149, %150 : vector<3x128xf32>
    %152 = arith.mulf %151, %16 : vector<3x128xf32>
    %cst_58 = arith.constant 6.86645508E-4 : f32
    %153 = vector.broadcast %cst_58 : f32 to vector<3x128xf32>
    %154 = arith.addf %152, %153 : vector<3x128xf32>
    %155 = arith.mulf %154, %16 : vector<3x128xf32>
    %cst_59 = arith.constant 0.000000e+00 : f32
    %156 = vector.broadcast %cst_59 : f32 to vector<3x128xf32>
    %157 = arith.addf %155, %156 : vector<3x128xf32>
    %158 = arith.mulf %135, %75 : vector<3x128xf32>
    %159 = arith.mulf %158, %116 : vector<3x128xf32>
    %160 = arith.mulf %53, %94 : vector<3x128xf32>
    %161 = arith.mulf %160, %157 : vector<3x128xf32>
    %162 = arith.divf %159, %161 : vector<3x128xf32>
    %163 = arith.subf %34, %22 : vector<3x128xf32>
    %164 = arith.subf %163, %28 : vector<3x128xf32>
    %cst_60 = arith.constant 4.58106136 : f32
    %165 = vector.broadcast %cst_60 : f32 to vector<3x128xf32>
    %166 = arith.addf %164, %165 : vector<3x128xf32>
    %167 = math.log %162 : vector<3x128xf32>
    %168 = arith.addf %166, %167 : vector<3x128xf32>
    %cst_61 = arith.constant 1.000000e+00 : f32
    %169 = vector.broadcast %cst_61 : f32 to vector<3x128xf32>
    %170 = arith.subf %3, %169 : vector<3x128xf32>
    %171 = math.log %15 : vector<3x128xf32>
    %172 = arith.mulf %170, %171 : vector<3x128xf32>
    %cst_62 = arith.constant 1.000000e+00 : f32
    %173 = vector.broadcast %cst_62 : f32 to vector<3x128xf32>
    %174 = arith.subf %4, %173 : vector<3x128xf32>
    %cst_63 = arith.constant 1.000000e+00 : f32
    %175 = vector.broadcast %cst_63 : f32 to vector<3x128xf32>
    %176 = arith.subf %175, %15 : vector<3x128xf32>
    %177 = math.log %176 : vector<3x128xf32>
    %178 = arith.mulf %174, %177 : vector<3x128xf32>
    %179 = arith.addf %172, %178 : vector<3x128xf32>
    %180 = arith.addf %179, %168 : vector<3x128xf32>
    %c1_i32 = arith.constant 1 : i32
    %181 = arith.muli %arg0, %c1_i32 : i32
    %182 = arith.addi %181, %arg1 : i32
    %c0_i32_64 = arith.constant 0 : i32
    %183 = arith.cmpi slt, %182, %c0_i32_64 : i32
    %184 = arith.extui %183 : i1 to i32
    %c0_i32_65 = arith.constant 0 : i32
    %185 = arith.cmpi ne, %184, %c0_i32_65 : i32
    scf.if %185 {
      %c0_68 = arith.constant 0 : index
      %c0_69 = arith.constant 0 : index
      %189 = vector.load %arg5[%c0_68, %c0_69] : memref<1x128xf32, #tpu.memory_space<vmem>>, vector<1x128xf32>
      %cst_70 = arith.constant dense<0.000000e+00> : vector<128xf32>
      %190 = vector.multi_reduction <add>, %180, %cst_70 [0] : vector<3x128xf32> to vector<128xf32>
      %191 = vector.shape_cast %190 : vector<128xf32> to vector<1x128xf32>
      %192 = arith.addf %189, %191 : vector<1x128xf32>
      %c0_71 = arith.constant 0 : index
      %c0_72 = arith.constant 0 : index
      %193 = vector.load %arg5[%c0_71, %c0_72] : memref<1x128xf32, #tpu.memory_space<vmem>>, vector<1x128xf32>
      tpu.vector_store %arg5[%c0_71, %c0_72], %192 {strides = array<i32>} : memref<1x128xf32, #tpu.memory_space<vmem>>, vector<1x128xf32>,
    } else {
    }
    %c0_i32_66 = arith.constant 0 : i32
    %186 = arith.cmpi sge, %182, %c0_i32_66 : i32
    %187 = arith.extui %186 : i1 to i32
    %c0_i32_67 = arith.constant 0 : i32
    %188 = arith.cmpi ne, %187, %c0_i32_67 : i32
    scf.if %188 {
      %189 = tpu.iota {dimensions = array<i32: 0>} : vector<3x128xi32>
      %190 = tpu.iota {dimensions = array<i32: 1>} : vector<3x128xi32>
      %c3_i32 = arith.constant 3 : i32
      %191 = arith.muli %182, %c3_i32 : i32
      %192 = vector.broadcast %191 : i32 to vector<3x128xi32>
      %193 = arith.addi %192, %189 : vector<3x128xi32>
      %c128_i32 = arith.constant 128 : i32
      %194 = vector.broadcast %c128_i32 : i32 to vector<3x128xi32>
      %195 = arith.muli %193, %194 : vector<3x128xi32>
      %196 = arith.addi %195, %190 : vector<3x128xi32>
      %c0_68 = arith.constant 0 : index
      %c0_69 = arith.constant 0 : index
      %197 = vector.load %arg5[%c0_68, %c0_69] : memref<1x128xf32, #tpu.memory_space<vmem>>, vector<1x128xf32>
      %c300_i32 = arith.constant 300 : i32
      %198 = vector.broadcast %c300_i32 : i32 to vector<3x128xi32>
      %199 = arith.cmpi slt, %196, %198 : vector<3x128xi32>
      %cst_70 = arith.constant 0.000000e+00 : f32
      %200 = vector.broadcast %cst_70 : f32 to vector<3x128xf32>
      %201 = arith.select %199, %180, %200 : vector<3x128xi1>, vector<3x128xf32>
      %cst_71 = arith.constant dense<0.000000e+00> : vector<128xf32>
      %202 = vector.multi_reduction <add>, %201, %cst_71 [0] : vector<3x128xf32> to vector<128xf32>
      %203 = vector.shape_cast %202 : vector<128xf32> to vector<1x128xf32>
      %204 = arith.addf %197, %203 : vector<1x128xf32>
      %c0_72 = arith.constant 0 : index
      %c0_73 = arith.constant 0 : index
      %205 = vector.load %arg5[%c0_72, %c0_73] : memref<1x128xf32, #tpu.memory_space<vmem>>, vector<1x128xf32>
      tpu.vector_store %arg5[%c0_72, %c0_73], %204 {strides = array<i32>} : memref<1x128xf32, #tpu.memory_space<vmem>>, vector<1x128xf32>,
    } else {
    }
    return
  }
  func.func @transform_0(%arg0: i32, %arg1: i32) -> (i32, i32) {
    %c1_i32 = arith.constant 1 : i32
    %0 = arith.muli %arg0, %c1_i32 : i32
    %1 = arith.addi %0, %arg1 : i32
    %c0_i32 = arith.constant 0 : i32
    %c0_i32_0 = arith.constant 0 : i32
    return %1, %c0_i32 : i32, i32
  }
  func.func @transform_1(%arg0: i32, %arg1: i32) -> (i32, i32) {
    %c1_i32 = arith.constant 1 : i32
    %0 = arith.muli %arg0, %c1_i32 : i32
    %1 = arith.addi %0, %arg1 : i32
    %c0_i32 = arith.constant 0 : i32
    %c0_i32_0 = arith.constant 0 : i32
    return %1, %c0_i32 : i32, i32
  }
  func.func @transform_2(%arg0: i32, %arg1: i32) -> (i32, i32) {
    %c1_i32 = arith.constant 1 : i32
    %0 = arith.muli %arg0, %c1_i32 : i32
    %1 = arith.addi %0, %arg1 : i32
    %c0_i32 = arith.constant 0 : i32
    %c0_i32_0 = arith.constant 0 : i32
    return %1, %c0_i32 : i32, i32
  }
  func.func @transform_3(%arg0: i32, %arg1: i32) -> (i32, i32) {
    %c0_i32 = arith.constant 0 : i32
    %c0_i32_0 = arith.constant 0 : i32
    return %arg0, %c0_i32 : i32, i32
  }
}

</mosaic_0001>

<bundles_post_ra>
// kernel: tpu_custom_call.1
= control target key start
LH: loop header
LB: loop body
LE: loop exit
PB: predicated region body
PF: predicated region fallthrough
CT: control target
= control target key end

     0   :  { %8 = vsyncpa [#allocation3], 0  ;;  %s482_s0 = inlined_call_operand.hbm [shape: f32[3,128], index: 0, kind: input, shape index: {}]   ;;  %s483_s1 = inlined_call_operand.hbm [shape: f32[3,128], index: 1, kind: input, shape index: {}]   ;;  %s484_s2 = inlined_call_operand.hbm [shape: f32[3,128], index: 2, kind: input, shape index: {}]   ;;  %s485_s3 = inlined_call_operand.hbm [shape: f32[1,128], index: 3, kind: output, shape index: {}]  }
   0x1   :  { %9 = vsyncpa [#allocation6], 0  ;;  %s33_s14 = sshll.u32 %s483_s1, 4  ;;  %s34_s14 = int_to_ptr.hbm [resolvable:$true] %s33_s14 }
   0x2   :  { %10 = vsyncpa [#allocation4], 0  ;;  %s393_s15 = smov [#allocation5]   ;;  %s19_s19 = sshll.u32 %s482_s0, 4  ;;  %s20_s19 = int_to_ptr.hbm [resolvable:$true] %s19_s19 }
   0x3   :  { %s35_s16 = sshll.u32 %s393_s15, 4  ;;  %s394_s20 = smov [#allocation2]   ;;  %s36_s16 = int_to_ptr.vmem [resolvable:$true] %s35_s16 }
   0x4   :  { %38 = dma.hbm_to_vmem [thread:$0]  %s34_s14, 64, %s36_s16, [#allocation6]  }
   0x5   :  { %s21_s21 = sshll.u32 %s394_s20, 4  ;;  %s47_s24 = sshll.u32 %s484_s2, 4  ;;  %s22_s21 = int_to_ptr.vmem [resolvable:$true] %s21_s21  ;;  %s48_s24 = int_to_ptr.hbm [resolvable:$true] %s47_s24 }
   0x6   :  { %24 = dma.hbm_to_vmem [thread:$0]  %s20_s19, 64, %s22_s21, [#allocation3]  }
   0x7   :  { %s395_s1 = smov [#allocation7]  }
   0x8   :  { %s49_s25 = sshll.u32 %s395_s1, 4  ;;  %s50_s25 = int_to_ptr.vmem [resolvable:$true] %s49_s25 }
   0x9   :  { %52 = dma.hbm_to_vmem [thread:$0]  %s48_s24, 64, %s50_s25, [#allocation6]  }
   0xa   :  { %387 = dma.done.wait [#allocation3], 64  }
   0xb   :  { %388 = vsyncadd [#allocation3], 4294967232 }
   0xc   :  { %389 = dma.done.wait [#allocation6], 128  }
   0xd   :  { %390 = vsyncadd [#allocation6], 4294967168  ;;  %v396_v0 = vmov 0.0   ;;  %v427_v1 = vld [vmem:[#allocation2] sm:$0x7]  ;;  %vm241_vm7 = vcmask 1042432  }
   0xe   :  { %72 = vst [vmem:[#allocation8] sm:$0x1] %v396_v0  ;;  %v429_v2 = vld [vmem:[#allocation5] sm:$0x7]  ;;  %v98_v4 = vmul.f32 9.536743e-07, %v427_v1  ;;  %s397_s0 = smov [#allocation8]  }
   0xf   :  { %v433_v3 = vadd.f32 %v429_v2, %v427_v1  ;;  %v123_v5 = vmul.f32 9.536743e-07, %v429_v2  ;;  %v75_v50 = vld [vmem:[#allocation7] sm:$0x7]  ;;  %s256_s2 = sshll.u32 %s397_s0, 4  ;;  %s258_s28 = sshll.u32 %s485_s3, 4  ;;  %s257_s2 = int_to_ptr.vmem [resolvable:$true] %s256_s2  ;;  %s259_s28 = int_to_ptr.hbm [resolvable:$true] %s258_s28 }
  0x10   :  { %v99_v7 = vadd.f32 3.1908352e-05, %v98_v4  ;;  %v110_v8 = vadd.f32 2.002716e-05, %v98_v4  ;;  %v77_v58 = vadd.f32 1e-06, %v75_v50  ;;  %vm76_vm0 = vcmp.eq.f32.partialorder %v75_v50, 0.0 }
  0x11   :  { %v148_v6 = vmul.f32 9.536743e-07, %v433_v3  ;;  %v124_v9 = vadd.f32 3.1908352e-05, %v123_v5  ;;  %v135_v10 = vadd.f32 2.002716e-05, %v123_v5  ;;  %v84_v5 = vadd.f32 5.5, %v427_v1 }
  0x12   :  { %v100_v11 = vmul.f32 %v99_v7, %v427_v1  ;;  %v111_v12 = vmul.f32 %v110_v8, %v427_v1  ;;  %v94_v7 = vadd.f32 5.5, %v433_v3  ;;  %vm79_vm1 = vcmp.eq.f32.partialorder %v75_v50, 1.0 }
  0x13   :  { %v149_v13 = vadd.f32 3.1908352e-05, %v148_v6  ;;  %v160_v14 = vadd.f32 2.002716e-05, %v148_v6  ;;  %v125_v15 = vmul.f32 %v124_v9, %v429_v2  ;;  %v136_v16 = vmul.f32 %v135_v10, %v429_v2 }
  0x14   :  { %v101_v17 = vadd.f32 0.00044473095, %v100_v11  ;;  %v112_v18 = vadd.f32 0.000166893, %v111_v12  ;;  %v78_v6 = vsel %vm76_vm0, %v77_v58, %v75_v50  ;;  %277 = vlog2.f32 %v84_v5 }
  0x15   :  { %v150_v19 = vmul.f32 %v149_v13, %v433_v3  ;;  %v161_v20 = vmul.f32 %v160_v14, %v433_v3  ;;  %v126_v21 = vadd.f32 0.00044473095, %v125_v15  ;;  %v137_v22 = vadd.f32 0.000166893, %v136_v16 }
  0x16   :  { %v102_v23 = vmul.f32 %v101_v17, %v427_v1  ;;  %v113_v24 = vmul.f32 %v112_v18, %v427_v1  ;;  %v269_v14 = vadd.f32 -1e-06, %v78_v6  ;;  %279 = vlog2.f32 %v94_v7 }
  0x17   :  { %v151_v25 = vadd.f32 0.00044473095, %v150_v19  ;;  %v127_v26 = vmul.f32 %v126_v21, %v429_v2  ;;  %v138_v27 = vmul.f32 %v137_v22, %v429_v2  ;;  %v162_v28 = vadd.f32 0.000166893, %v161_v20 }
  0x18   :  { %v103_v29 = vadd.f32 0.003305158, %v102_v23  ;;  %v114_v30 = vadd.f32 0.0007009506, %v113_v24  ;;  %v89_v16 = vadd.f32 5.5, %v429_v2  ;;  %v81_v20 = vsel %vm79_vm1, %v269_v14, %v78_v6 }
  0x19   :  { %v128_v31 = vadd.f32 0.003305158, %v127_v26  ;;  %v139_v32 = vadd.f32 0.0007009506, %v138_v27  ;;  %v152_v33 = vmul.f32 %v151_v25, %v433_v3  ;;  %v163_v36 = vmul.f32 %v162_v28, %v433_v3 }
  0x1a   :  { %v104_v34 = vmul.f32 %v103_v29, %v427_v1  ;;  %v115_v35 = vmul.f32 %v114_v30, %v427_v1  ;;  %v278_v21 = vpop.eup %277  ;;  %v203_v26 = vsub.f32 1.0, %v81_v20  ;;  %v83_v28 = vadd.f32 0.5, %v427_v1 }
  0x1b   :  { %v129_v37 = vmul.f32 %v128_v31, %v429_v2  ;;  %v153_v38 = vadd.f32 0.003305158, %v152_v33  ;;  %v164_v40 = vadd.f32 0.0007009506, %v163_v36  ;;  %v140_v42 = vmul.f32 %v139_v32, %v429_v2 }
  0x1c   :  { %v105_v39 = vadd.f32 0.0138138905, %v104_v34  ;;  %v116_v44 = vadd.f32 0.0015487671, %v115_v35  ;;  %v280_v22 = vpop.eup %279  ;;  %v93_v29 = vadd.f32 0.5, %v433_v3  ;;  %v86_v30 = vmul.f32 0.6931472, %v278_v21 }
  0x1d   :  { %v130_v41 = vadd.f32 0.0138138905, %v129_v37  ;;  %v154_v45 = vmul.f32 %v153_v38, %v433_v3  ;;  %v165_v46 = vmul.f32 %v164_v40, %v433_v3  ;;  %v141_v52 = vadd.f32 0.0015487671, %v140_v42 }
  0x1e   :  { %v106_v43 = vmul.f32 %v105_v39, %v427_v1  ;;  %v117_v54 = vmul.f32 %v116_v44, %v427_v1  ;;  %v96_v31 = vmul.f32 0.6931472, %v280_v22  ;;  %v88_v39 = vadd.f32 0.5, %v429_v2 }
  0x1f   :  { %v131_v47 = vmul.f32 %v130_v41, %v429_v2  ;;  %v166_v49 = vadd.f32 0.0015487671, %v165_v46  ;;  %v155_v55 = vadd.f32 0.0138138905, %v154_v45  ;;  %v142_v63 = vmul.f32 %v141_v52, %v429_v2 }
  0x20   :  { %v107_v48 = vadd.f32 0.030785622, %v106_v43  ;;  %v118_v62 = vadd.f32 0.0016822815, %v117_v54  ;;  %v87_v41 = vmul.f32 %v86_v30, %v83_v28 }
  0x21   :  { %v132_v51 = vadd.f32 0.030785622, %v131_v47  ;;  %v167_v56 = vmul.f32 %v166_v49, %v433_v3  ;;  %v156_v0 = vmul.f32 %v155_v55, %v433_v3  ;;  %v143_v11 = vadd.f32 0.0016822815, %v142_v63 }
  0x22   :  { %v108_v53 = vmul.f32 %v107_v48, %v427_v1  ;;  %v119_v10 = vmul.f32 %v118_v62, %v427_v1  ;;  %v229_v47 = vlaneseq  ;;  %v270_v55 = vadd.f32 -1.0, %v427_v1 }
  0x23   :  { %v133_v57 = vmul.f32 %v132_v51, %v429_v2  ;;  %v168_v60 = vadd.f32 0.0016822815, %v167_v56  ;;  %v157_v12 = vadd.f32 0.030785622, %v156_v0  ;;  %v144_v18 = vmul.f32 %v143_v11, %v429_v2 }
  0x24   :  { %v109_v59 = vadd.f32 0.028581232, %v108_v53  ;;  %v120_v17 = vadd.f32 0.0006866455, %v119_v10  ;;  %v230_v54 = vshrl.u32 %v229_v47, 7 }
  0x25   :  { %v134_v61 = vadd.f32 0.028581232, %v133_v57  ;;  %v169_v4 = vmul.f32 %v168_v60, %v433_v3  ;;  %v158_v19 = vmul.f32 %v157_v12, %v433_v3  ;;  %v145_v24 = vadd.f32 0.0006866455, %v144_v18 }
  0x26   :  { %v121_v23 = vmul.f32 %v120_v17, %v427_v1  ;;  %v271_v57 = vadd.f32 -1.0, %v429_v2  ;;  %v232_v60 = vand.u32 127, %v229_v47 }
  0x27   :  { %v170_v8 = vadd.f32 0.0006866455, %v169_v4  ;;  %v175_v9 = vmul.f32 %v134_v61, %v109_v59  ;;  %v159_v25 = vadd.f32 0.028581232, %v158_v19  ;;  %v146_v33 = vmul.f32 %v145_v24, %v429_v2 }
  0x28   :  { %v236_v61 = vmul.u32 128, %v230_v54 }
  0x29   :  { %v171_v13 = vmul.f32 %v170_v8, %v433_v3  ;;  %v173_v34 = vmul.f32 %v159_v25, %v121_v23  ;;  %v97_v3 = vmul.f32 %v96_v31, %v93_v29 }
  0x2a   :  { %v237_v5 = vadd.s32 %v236_v61, %v232_v60 }
  0x2b   :  { %v176_v15 = vmul.f32 %v175_v9, %v171_v13  ;;  %v174_v45 = vmul.f32 %v173_v34, %v146_v33  ;;  %v192_v52 = vsub.f32 %v97_v3, %v87_v41 }
  0x2c   :  { %vm239_vm6 = vcmp.lt.s32.totalorder %v237_v5, 300 }
  0x2d   :  { %281 = vrcp.f32 %v176_v15  ;;  %v188_v35 = vand.u32 2147483648, %v176_v15  ;;  %vm182_vm2 = vweird.f32 %v176_v15  ;;  %v186_v38 = vand.u32 2147483647, %v176_v15 }
  0x2e   :  { %283 = vlog2.f32 %v89_v16 }
  0x2f   :  { %285 = vlog2.f32 %v81_v20  ;;  %v189_v43 = vor.u32 1.1754944e-38, %v188_v35  ;;  %vm187_vm5 = vcmp.eq.f32.partialorder %v186_v38, 8.507059e+37 }
  0x30   :  { %287 = vlog2.f32 %v203_v26 }
  0x33   :  { %v282_v27 = vpop.eup %281 }
  0x34   :  { %v178_v32 = vmul.f32 %v282_v27, %v176_v15  ;;  %v284_v36 = vpop.eup %283  ;;  %vm183_vm3 = vweird.f32 %v282_v27  ;;  %v238_v15 = vld [vmem:[#allocation8] sm:$0x1] }
  0x35   :  { %v91_v42 = vmul.f32 0.6931472, %v284_v36  ;;  %vm184_vm4 = vmor %vm182_vm2, %vm183_vm3  ;;  %v286_v44 = vpop.eup %285 }
  0x36   :  { %v179_v37 = vsub.f32 1.0, %v178_v32  ;;  %v288_v48 = vpop.eup %287  ;;  %v200_v56 = vmul.f32 0.6931472, %v286_v44 }
  0x37   :  { %v92_v50 = vmul.f32 %v91_v42, %v88_v39  ;;  %v205_v58 = vmul.f32 0.6931472, %v288_v48 }
  0x38   :  { %v180_v40 = vmul.f32 %v282_v27, %v179_v37  ;;  %v201_v62 = vmul.f32 %v270_v55, %v200_v56 }
  0x39   :  { %v193_v59 = vsub.f32 %v192_v52, %v92_v50  ;;  %v206_v63 = vmul.f32 %v271_v57, %v205_v58 }
  0x3a   :  { %v181_v46 = vadd.f32 %v282_v27, %v180_v40 }
  0x3b   :  { %v194_v0 = vadd.f32 4.5810614, %v193_v59  ;;  %v207_v7 = vadd.f32 %v206_v63, %v201_v62 }
  0x3c   :  { %v185_v49 = vsel %vm184_vm4, %v282_v27, %v181_v46 }
  0x3d   :  { %v190_v51 = vsel %vm187_vm5, %v189_v43, %v185_v49 }
  0x3e   :  { %v191_v53 = vmul.f32 %v190_v51, %v174_v45 }
  0x40   :  { %289 = vlog2.f32 %v191_v53 }
  0x46   :  { %v290_v4 = vpop.eup %289 }
  0x47   :  { %v196_v6 = vmul.f32 0.6931472, %v290_v4 }
  0x49   :  { %v197_v8 = vadd.f32 %v196_v6, %v194_v0 }
  0x4b   :  { %v208_v9 = vadd.f32 %v207_v7, %v197_v8 }
  0x4d   :  { %v240_v1 = vsel %vm239_vm6, %v208_v9, 0.0 }
  0x4e   :  { %v242_v10 = vsel %vm241_vm7, %v240_v1, 0.0 }
  0x4f   :  { %v243_v11 = vrot.slane %v242_v10, 4 }
  0x51   :  { %v244_v2 = vadd.f32 %v243_v11, %v242_v10 }
  0x53   :  { %v245_v12 = vrot.slane %v244_v2, 2 }
  0x55   :  { %v246_v13 = vadd.f32 %v245_v12, %v244_v2 }
  0x57   :  { %v247_v14 = vrot.slane %v246_v13, 1 }
  0x59   :  { %v248_v16 = vadd.f32 %v247_v14, %v246_v13 }
  0x5b   :  { %v249_v17 = vadd.f32 %v248_v16, %v238_v15 }
  0x5d   :  { %250 = vst [vmem:[#allocation8] sm:$0x1] %v249_v17 }
  0x5e   :  { %261 = dma.vmem_to_hbm [thread:$0]  %s257_s2, 16, %s259_s28, [#allocation4]  }
  0x5f   :  { %391 = dma.done.wait [#allocation4], 16  }
  0x60   :  { %392 = vsyncadd [#allocation4], 4294967280 }
  0x61   :  { %266 = vsyncpa [#allocation3], 1 }
  0x62   :  { %267 = vsyncpa [#allocation6], 1 }
  0x63   :  { %268 = vsyncpa [#allocation4], 1 }

</bundles_post_ra>
